<compile_context>
chip_gen: v5e
topology: v5e:2x2
jax: 0.10.0
libtpu: 0.0.40
codegen_flags: <defaults>
</compile_context>

<pallas_src>
import functools
import math

import jax
import jax.numpy as jnp
from jax.experimental import pallas as pl
from jax.experimental.pallas import tpu as pltpu

ATTN_DECODER_RNN_MAX_LENGTH = 8  # module-level constant in the original repo


def _round_up(x, m):
    return ((x + m - 1) // m) * m


def _decoder_kernel(double, triple, *refs):
    """Fused (optional Linear+ReLU) x2 + one (TB, TN) tile of the final Linear.

    refs layout (depending on flags):
      [x, (w1, b1)?, (w3, b3)?, w2, b2, out]
    Hidden weights arrive as whole (resident) arrays; w2 / b2 / out arrive as
    (.., TN) output-feature tiles; x arrives as a (TB, E) bf16 batch tile.
    """
    refs = list(refs)
    x_ref = refs.pop(0)
    out_ref = refs.pop(-1)
    b2_ref = refs.pop(-1)
    w2_ref = refs.pop(-1)

    # Activations already arrive in bf16 (cast once in the wrapper).
    h = x_ref[...]

    if double:
        w1_ref = refs.pop(0)
        b1_ref = refs.pop(0)
        h32 = jnp.dot(h, w1_ref[...], preferred_element_type=jnp.float32)
        h = jnp.maximum(h32 + b1_ref[...], 0.0).astype(jnp.bfloat16)

    if triple:
        w3_ref = refs.pop(0)
        b3_ref = refs.pop(0)
        h32 = jnp.dot(h, w3_ref[...], preferred_element_type=jnp.float32)
        h = jnp.maximum(h32 + b3_ref[...], 0.0).astype(jnp.bfloat16)

    y = jnp.dot(h, w2_ref[...], preferred_element_type=jnp.float32) + b2_ref[...]
    out_ref[...] = y.astype(out_ref.dtype)


def _vmem_footprint(TB, TN, K_final, E, hidden_layers, out_itemsize,
                    w2_buffers=2):
    """Rough per-call VMEM bytes for the chosen tile sizes."""
    total = 2 * TB * E * 2                      # x tile, bf16, double-buffered
    total += w2_buffers * K_final * TN * 2      # w2 tile, bf16
    total += 2 * 8 * TN * 4                     # b2 tile (sublane-padded), f32
    total += 2 * TB * TN * out_itemsize         # output tile, double-buffered
    for fin, fout in hidden_layers:             # resident hidden weights/biases
        total += 2 * (fin * fout * 2 + 8 * fout * 4)
    # In-kernel temporaries: h (f32 + bf16 copies) and the f32 y tile.
    total += TB * K_final * 6 + TB * TN * 4
    return total


def _select_tiles(B, N, K_final, E, hidden_layers, out_itemsize,
                  tb_max, tn_max, tile_budget):
    """Pick (TB, TN): sublane/lane-dense tiles, as large as the VMEM budget allows."""
    tn_max = max(128, (int(tn_max) // 128) * 128)   # lane-dense, >= 128
    tb_max = max(8, (int(tb_max) // 8) * 8)         # sublane-dense, >= 8

    TB = tb_max if B >= tb_max else _round_up(max(B, 1), 8)

    N_128 = _round_up(N, 128)
    if N_128 <= tn_max:
        TN = N_128                                  # a single lane-dense tile
    else:
        # Prefer big tiles (DMA efficiency, fewer ~0.35us grid steps); accept up
        # to ~25% zero padding rather than dropping to 128-wide tiles.
        TN = 128
        for cand in (tn_max, 1024, 512, 256, 128):
            if cand > tn_max:
                continue
            if _round_up(N, cand) - N_128 <= max(N_128 // 4, 128):
                TN = cand
                break

    def fits(tb, tn):
        return _vmem_footprint(tb, tn, K_final, E, hidden_layers,
                               out_itemsize) <= tile_budget

    while not fits(TB, TN) and TN > 128:
        TN = max(128, ((TN // 2) // 128) * 128)
    while not fits(TB, TN) and TB > 8:
        TB = max(8, ((TB // 2) // 8) * 8)
    return TB, TN


def linear_decoder_words_guesser(
    embedding,
    params,
    *,
    functions_subtokens_num,
    double_linear_decoder=False,
    triple_linear_decoder=False,
    tb_max=256,
    tn_max=2048,
    out_dtype=jnp.float32,
):
    """JAX wrapper reproducing LinearDecoderWordsGuesser.forward."""
    B, E = embedding.shape
    N = functions_subtokens_num * ATTN_DECODER_RNN_MAX_LENGTH
    out_itemsize = jnp.dtype(out_dtype).itemsize

    w2 = params["w2"].astype(jnp.bfloat16)
    b2 = params["b2"].astype(jnp.float32)
    K_final = w2.shape[0]

    hidden_layers = []
    if double_linear_decoder:
        hidden_layers.append(tuple(params["w1"].shape))
    if triple_linear_decoder:
        hidden_layers.append(tuple(params["w3"].shape))
        if not double_linear_decoder and params["w3"].shape[0] != E:
            # Same constraint as the PyTorch module: the third layer is
            # Linear(linear_embedding_size, linear_embedding_size) applied to
            # the raw embedding, so the sizes must match.
            raise ValueError(
                "triple_linear_decoder without double_linear_decoder requires "
                "linear_embedding_size == embedding_size")

    # ---- VMEM budget / tile selection --------------------------------------
    try:
        vmem_capacity = int(pltpu.get_tpu_info().vmem_capacity_bytes)
    except Exception:
        vmem_capacity = 64 * 1024 * 1024   # conservative default (v7x per-TC)
    tile_budget = int(vmem_capacity * 0.55)

    TB, TN = _select_tiles(B, N, K_final, E, hidden_layers, out_itemsize,
                           tb_max, tn_max, tile_budget)
    B_pad = _round_up(B, TB)
    N_pad = _round_up(N, TN)
    n_tiles = N_pad // TN
    b_tiles = B_pad // TB
    # Batch is the innermost (fastest) grid axis: the w2 / b2 block index is
    # constant across it, so Pallas fetches each w2 tile exactly once.
    grid = (n_tiles, b_tiles)

    # Triple-buffer the streaming w2 tile in the pure HBM-stream regime
    # (single batch tile, multiple feature tiles) when VMEM headroom allows.
    w2_buffers = 2
    if (b_tiles == 1 and n_tiles >= 2 and hasattr(pl, "Buffered")
            and _vmem_footprint(TB, TN, K_final, E, hidden_layers,
                                out_itemsize, w2_buffers=3) <= tile_budget):
        w2_buffers = 3
    footprint = _vmem_footprint(TB, TN, K_final, E, hidden_layers,
                                out_itemsize, w2_buffers=w2_buffers)
    vmem_limit_bytes = max(
        32 * 1024 * 1024,
        min(int(vmem_capacity * 0.85), footprint + 16 * 1024 * 1024))

    # ---- pad / cast operands ------------------------------------------------
    x = embedding.astype(jnp.bfloat16)        # bf16 MXU input; halves x DMA
    if B_pad != B:
        x = jnp.pad(x, ((0, B_pad - B), (0, 0)))
    if N_pad != N:
        w2 = jnp.pad(w2, ((0, 0), (0, N_pad - N)))
        b2 = jnp.pad(b2, ((0, 0), (0, N_pad - N)))

    kernel_inputs = [x]
    in_specs = [pl.BlockSpec((TB, E), lambda j, i: (i, 0))]
    flops = 0
    bytes_accessed = B_pad * E * 2 * n_tiles   # x is re-read per feature tile

    if double_linear_decoder:
        w1 = params["w1"].astype(jnp.bfloat16)
        b1 = params["b1"].astype(jnp.float32)
        kernel_inputs += [w1, b1]
        in_specs += [
            pl.BlockSpec(w1.shape, lambda j, i: (0, 0)),
            pl.BlockSpec(b1.shape, lambda j, i: (0, 0)),
        ]
        flops += 2 * B_pad * w1.shape[0] * w1.shape[1] * n_tiles
        bytes_accessed += int(w1.size) * 2 + int(b1.size) * 4

    if triple_linear_decoder:
        w3 = params["w3"].astype(jnp.bfloat16)
        b3 = params["b3"].astype(jnp.float32)
        kernel_inputs += [w3, b3]
        in_specs += [
            pl.BlockSpec(w3.shape, lambda j, i: (0, 0)),
            pl.BlockSpec(b3.shape, lambda j, i: (0, 0)),
        ]
        flops += 2 * B_pad * w3.shape[0] * w3.shape[1] * n_tiles
        bytes_accessed += int(w3.size) * 2 + int(b3.size) * 4

    kernel_inputs += [w2, b2]
    w2_block, w2_map = (K_final, TN), (lambda j, i: (0, j))
    if w2_buffers > 2:
        try:
            w2_spec = pl.BlockSpec(w2_block, w2_map,
                                   pipeline_mode=pl.Buffered(3))
        except TypeError:  # older jax without pipeline_mode on BlockSpec
            w2_spec = pl.BlockSpec(w2_block, w2_map)
    else:
        w2_spec = pl.BlockSpec(w2_block, w2_map)
    in_specs += [w2_spec, pl.BlockSpec((1, TN), lambda j, i: (0, j))]
    out_spec = pl.BlockSpec((TB, TN), lambda j, i: (i, j))

    flops += 2 * B_pad * K_final * N_pad
    bytes_accessed += K_final * N_pad * 2 + N_pad * 4   # w2 / b2 read once
    bytes_accessed += B_pad * N_pad * out_itemsize      # output writeback

    kernel = functools.partial(
        _decoder_kernel, double_linear_decoder, triple_linear_decoder)

    word_guess_flat = pl.pallas_call(
        kernel,
        out_shape=jax.ShapeDtypeStruct((B_pad, N_pad), out_dtype),
        grid_spec=pltpu.PrefetchScalarGridSpec(
            num_scalar_prefetch=0,
            grid=grid,
            in_specs=in_specs,
            out_specs=out_spec,
        ),
        compiler_params=pltpu.CompilerParams(
            dimension_semantics=("parallel", "parallel"),
            vmem_limit_bytes=int(vmem_limit_bytes),
        ),
        cost_estimate=pl.CostEstimate(
            flops=int(flops), transcendentals=0,
            bytes_accessed=int(bytes_accessed)),
    )(*kernel_inputs)

    # Strip padding, then same element ordering as torch.reshape((-1, L, S)).
    word_guess_flat = word_guess_flat[:B, :N]
    return word_guess_flat.reshape(
        -1, ATTN_DECODER_RNN_MAX_LENGTH, functions_subtokens_num
    )


def init_params(
    key,
    embedding_size,
    functions_subtokens_num,
    *,
    double_linear_decoder=False,
    linear_embedding_size=None,
    triple_linear_decoder=False,
):
    """Deterministic init mimicking nn.Linear's U(-1/sqrt(fan_in), 1/sqrt(fan_in)).

    Weights are stored as [in_features, out_features] (transposed vs PyTorch)
    in bf16 (the kernel's MXU input dtype); biases stay f32.  Layer wiring
    matches the PyTorch module exactly."""
    params = {}

    def linear_init(k, fan_in, fan_out):
        kw, kb = jax.random.split(k)
        bound = 1.0 / math.sqrt(fan_in)
        w = jax.random.uniform(
            kw, (fan_in, fan_out), jnp.float32, minval=-bound, maxval=bound
        ).astype(jnp.bfloat16)
        b = jax.random.uniform(
            kb, (1, fan_out), jnp.float32, minval=-bound, maxval=bound
        )
        return w, b

    keys = jax.random.split(key, 3)
    out_features = functions_subtokens_num * ATTN_DECODER_RNN_MAX_LENGTH

    if double_linear_decoder:
        params["w1"], params["b1"] = linear_init(
            keys[0], embedding_size, linear_embedding_size
        )
        final_in = linear_embedding_size
    else:
        final_in = embedding_size

    if triple_linear_decoder:
        if not double_linear_decoder and linear_embedding_size != embedding_size:
            raise ValueError(
                "triple_linear_decoder without double_linear_decoder requires "
                "linear_embedding_size == embedding_size (same constraint as "
                "the PyTorch module).")
        params["w3"], params["b3"] = linear_init(
            keys[1], linear_embedding_size, linear_embedding_size
        )

    params["w2"], params["b2"] = linear_init(keys[2], final_in, out_features)
    return params


def _reference_forward(
    embedding, params, *, functions_subtokens_num,
    double_linear_decoder, triple_linear_decoder
):
    """Pure-JAX reference using the same bf16-input / f32-accum math."""
    h = embedding.astype(jnp.bfloat16)
    if double_linear_decoder:
        h32 = jnp.dot(h, params["w1"], preferred_element_type=jnp.float32)
        h = jnp.maximum(h32 + params["b1"], 0.0).astype(jnp.bfloat16)
    if triple_linear_decoder:
        h32 = jnp.dot(h, params["w3"], preferred_element_type=jnp.float32)
        h = jnp.maximum(h32 + params["b3"], 0.0).astype(jnp.bfloat16)
    y = jnp.dot(h, params["w2"], preferred_element_type=jnp.float32) + params["b2"]
    return y.reshape(-1, ATTN_DECODER_RNN_MAX_LENGTH, functions_subtokens_num)


if __name__ == "__main__":
    key = jax.random.PRNGKey(0)
    k1, k2, k3, k4, k5, k6 = jax.random.split(key, 6)

    # --- config 1: double + triple decoder, exact-fit shapes ----------------
    batch = 2
    embedding_size = 32
    linear_embedding_size = 32
    functions_subtokens_num = 16  # N = 128

    params = init_params(
        k1, embedding_size, functions_subtokens_num,
        double_linear_decoder=True,
        linear_embedding_size=linear_embedding_size,
        triple_linear_decoder=True,
    )
    embedding = jax.random.normal(k2, (batch, embedding_size), jnp.float32)

    out1 = linear_decoder_words_guesser(
        embedding, params,
        functions_subtokens_num=functions_subtokens_num,
        double_linear_decoder=True, triple_linear_decoder=True,
    )
    out1 = jax.block_until_ready(out1)
    ref1 = _reference_forward(
        embedding, params,
        functions_subtokens_num=functions_subtokens_num,
        double_linear_decoder=True, triple_linear_decoder=True,
    )
    assert out1.shape == (batch, ATTN_DECODER_RNN_MAX_LENGTH,
                          functions_subtokens_num), out1.shape
    assert jnp.allclose(out1, ref1, atol=1e-2, rtol=1e-2)

    # --- config 2: single linear layer, shapes that exercise lane padding ---
    batch2 = 5
    embedding_size2 = 48
    functions_subtokens_num2 = 20  # N = 160 -> padded to one 256-lane tile
    params2 = init_params(
        k3, embedding_size2, functions_subtokens_num2,
        double_linear_decoder=False, triple_linear_decoder=False,
    )
    embedding2 = jax.random.normal(k4, (batch2, embedding_size2), jnp.float32)

    out2 = linear_decoder_words_guesser(
        embedding2, params2,
        functions_subtokens_num=functions_subtokens_num2,
        double_linear_decoder=False, triple_linear_decoder=False,
    )
    out2 = jax.block_until_ready(out2)
    ref2 = _reference_forward(
        embedding2, params2,
        functions_subtokens_num=functions_subtokens_num2,
        double_linear_decoder=False, triple_linear_decoder=False,
    )
    assert out2.shape == (batch2, ATTN_DECODER_RNN_MAX_LENGTH,
                          functions_subtokens_num2), out2.shape
    assert jnp.allclose(out2, ref2, atol=1e-2, rtol=1e-2)

    # --- config 3: multi-tile grid (3x3) to exercise the reordered grid -----
    # Small tile overrides force several batch and feature tiles so the
    # (N-outer, batch-inner) index maps and both padding paths are validated.
    batch3 = 20
    embedding_size3 = 32
    linear_embedding_size3 = 64
    functions_subtokens_num3 = 48  # N = 384 -> 3 feature tiles of 128
    params3 = init_params(
        k5, embedding_size3, functions_subtokens_num3,
        double_linear_decoder=True,
        linear_embedding_size=linear_embedding_size3,
        triple_linear_decoder=False,
    )
    embedding3 = jax.random.normal(k6, (batch3, embedding_size3), jnp.float32)

    out3 = linear_decoder_words_guesser(
        embedding3, params3,
        functions_subtokens_num=functions_subtokens_num3,
        double_linear_decoder=True, triple_linear_decoder=False,
        tb_max=8, tn_max=128,
    )
    out3 = jax.block_until_ready(out3)
    ref3 = _reference_forward(
        embedding3, params3,
        functions_subtokens_num=functions_subtokens_num3,
        double_linear_decoder=True, triple_linear_decoder=False,
    )
    assert out3.shape == (batch3, ATTN_DECODER_RNN_MAX_LENGTH,
                          functions_subtokens_num3), out3.shape
    assert jnp.allclose(out3, ref3, atol=1e-2, rtol=1e-2)

    print("KERNEL_OK")
</pallas_src>

<mosaic_0001>
module attributes {stable_mosaic.version = 11 : i64} {
  func.func @_decoder_kernel(%arg0: i32, %arg1: i32, %arg2: memref<8x32xbf16, #tpu.memory_space<vmem>>, %arg3: memref<32x32xbf16, #tpu.memory_space<vmem>>, %arg4: memref<1x32xf32, #tpu.memory_space<vmem>>, %arg5: memref<32x32xbf16, #tpu.memory_space<vmem>>, %arg6: memref<1x32xf32, #tpu.memory_space<vmem>>, %arg7: memref<32x128xbf16, #tpu.memory_space<vmem>>, %arg8: memref<1x128xf32, #tpu.memory_space<vmem>>, %arg9: memref<8x128xf32, #tpu.memory_space<vmem>>) attributes {dimension_semantics = [#tpu.dimension_semantics<parallel>, #tpu.dimension_semantics<parallel>], iteration_bounds = array<i64: 1, 1>, scalar_prefetch = 0 : i64, scratch_operands = 0 : i64, tpu.core_type = #tpu.core_type<tc>, window_params = [{transform_indices = @transform_0, window_bounds = array<i64: 8, 32>}, {pipeline_mode = #tpu.pipeline_mode<synchronous>, transform_indices = @transform_1, window_bounds = array<i64: 32, 32>}, {pipeline_mode = #tpu.pipeline_mode<synchronous>, transform_indices = @transform_2, window_bounds = array<i64: 1, 32>}, {pipeline_mode = #tpu.pipeline_mode<synchronous>, transform_indices = @transform_3, window_bounds = array<i64: 32, 32>}, {pipeline_mode = #tpu.pipeline_mode<synchronous>, transform_indices = @transform_4, window_bounds = array<i64: 1, 32>}, {transform_indices = @transform_5, window_bounds = array<i64: 32, 128>}, {transform_indices = @transform_6, window_bounds = array<i64: 1, 128>}, {transform_indices = @transform_7, window_bounds = array<i64: 8, 128>}]} {
    %c0 = arith.constant 0 : index
    %c0_0 = arith.constant 0 : index
    %0 = vector.load %arg2[%c0, %c0_0] : memref<8x32xbf16, #tpu.memory_space<vmem>>, vector<8x32xbf16>
    %c0_1 = arith.constant 0 : index
    %c0_2 = arith.constant 0 : index
    %1 = vector.load %arg3[%c0_1, %c0_2] : memref<32x32xbf16, #tpu.memory_space<vmem>>, vector<32x32xbf16>
    %cst = arith.constant dense<0.000000e+00> : vector<8x32xf32>
    %2 = tpu.matmul %0, %1, %cst {dimension_numbers = #tpu.dot_dimension_numbers<[1], [0], [0], [1], [0, 0, 1, 1], [], []>} : vector<8x32xbf16>, vector<32x32xbf16>, vector<8x32xf32> -> vector<8x32xf32>
    %c0_3 = arith.constant 0 : index
    %c0_4 = arith.constant 0 : index
    %3 = vector.load %arg4[%c0_3, %c0_4] : memref<1x32xf32, #tpu.memory_space<vmem>>, vector<1x32xf32>
    %4 = vector.broadcast %3 : vector<1x32xf32> to vector<8x32xf32>
    %5 = arith.addf %2, %4 : vector<8x32xf32>
    %cst_5 = arith.constant 0.000000e+00 : f32
    %6 = vector.broadcast %cst_5 : f32 to vector<8x32xf32>
    %7 = arith.maximumf %5, %6 : vector<8x32xf32>
    %8 = arith.truncf %7 : vector<8x32xf32> to vector<8x32xbf16>
    %c0_6 = arith.constant 0 : index
    %c0_7 = arith.constant 0 : index
    %9 = vector.load %arg5[%c0_6, %c0_7] : memref<32x32xbf16, #tpu.memory_space<vmem>>, vector<32x32xbf16>
    %cst_8 = arith.constant dense<0.000000e+00> : vector<8x32xf32>
    %10 = tpu.matmul %8, %9, %cst_8 {dimension_numbers = #tpu.dot_dimension_numbers<[1], [0], [0], [1], [0, 0, 1, 1], [], []>} : vector<8x32xbf16>, vector<32x32xbf16>, vector<8x32xf32> -> vector<8x32xf32>
    %c0_9 = arith.constant 0 : index
    %c0_10 = arith.constant 0 : index
    %11 = vector.load %arg6[%c0_9, %c0_10] : memref<1x32xf32, #tpu.memory_space<vmem>>, vector<1x32xf32>
    %12 = vector.broadcast %11 : vector<1x32xf32> to vector<8x32xf32>
    %13 = arith.addf %10, %12 : vector<8x32xf32>
    %cst_11 = arith.constant 0.000000e+00 : f32
    %14 = vector.broadcast %cst_11 : f32 to vector<8x32xf32>
    %15 = arith.maximumf %13, %14 : vector<8x32xf32>
    %16 = arith.truncf %15 : vector<8x32xf32> to vector<8x32xbf16>
    %c0_12 = arith.constant 0 : index
    %c0_13 = arith.constant 0 : index
    %17 = vector.load %arg7[%c0_12, %c0_13] : memref<32x128xbf16, #tpu.memory_space<vmem>>, vector<32x128xbf16>
    %cst_14 = arith.constant dense<0.000000e+00> : vector<8x128xf32>
    %18 = tpu.matmul %16, %17, %cst_14 {dimension_numbers = #tpu.dot_dimension_numbers<[1], [0], [0], [1], [0, 0, 1, 1], [], []>} : vector<8x32xbf16>, vector<32x128xbf16>, vector<8x128xf32> -> vector<8x128xf32>
    %c0_15 = arith.constant 0 : index
    %c0_16 = arith.constant 0 : index
    %19 = vector.load %arg8[%c0_15, %c0_16] : memref<1x128xf32, #tpu.memory_space<vmem>>, vector<1x128xf32>
    %20 = vector.broadcast %19 : vector<1x128xf32> to vector<8x128xf32>
    %21 = arith.addf %18, %20 : vector<8x128xf32>
    %c0_17 = arith.constant 0 : index
    %c0_18 = arith.constant 0 : index
    %22 = vector.load %arg9[%c0_17, %c0_18] : memref<8x128xf32, #tpu.memory_space<vmem>>, vector<8x128xf32>
    tpu.vector_store %arg9[%c0_17, %c0_18], %21 {strides = array<i32>} : memref<8x128xf32, #tpu.memory_space<vmem>>, vector<8x128xf32>,
    return
  }
  func.func @transform_0(%arg0: i32, %arg1: i32) -> (i32, i32) {
    %c0_i32 = arith.constant 0 : i32
    %c0_i32_0 = arith.constant 0 : i32
    return %arg1, %c0_i32 : i32, i32
  }
  func.func @transform_1(%arg0: i32, %arg1: i32) -> (i32, i32) {
    %c0_i32 = arith.constant 0 : i32
    %c0_i32_0 = arith.constant 0 : i32
    %c0_i32_1 = arith.constant 0 : i32
    return %c0_i32, %c0_i32_0 : i32, i32
  }
  func.func @transform_2(%arg0: i32, %arg1: i32) -> (i32, i32) {
    %c0_i32 = arith.constant 0 : i32
    %c0_i32_0 = arith.constant 0 : i32
    %c0_i32_1 = arith.constant 0 : i32
    return %c0_i32, %c0_i32_0 : i32, i32
  }
  func.func @transform_3(%arg0: i32, %arg1: i32) -> (i32, i32) {
    %c0_i32 = arith.constant 0 : i32
    %c0_i32_0 = arith.constant 0 : i32
    %c0_i32_1 = arith.constant 0 : i32
    return %c0_i32, %c0_i32_0 : i32, i32
  }
  func.func @transform_4(%arg0: i32, %arg1: i32) -> (i32, i32) {
    %c0_i32 = arith.constant 0 : i32
    %c0_i32_0 = arith.constant 0 : i32
    %c0_i32_1 = arith.constant 0 : i32
    return %c0_i32, %c0_i32_0 : i32, i32
  }
  func.func @transform_5(%arg0: i32, %arg1: i32) -> (i32, i32) {
    %c0_i32 = arith.constant 0 : i32
    %c0_i32_0 = arith.constant 0 : i32
    return %c0_i32, %arg0 : i32, i32
  }
  func.func @transform_6(%arg0: i32, %arg1: i32) -> (i32, i32) {
    %c0_i32 = arith.constant 0 : i32
    %c0_i32_0 = arith.constant 0 : i32
    return %c0_i32, %arg0 : i32, i32
  }
  func.func @transform_7(%arg0: i32, %arg1: i32) -> (i32, i32) {
    %c0_i32 = arith.constant 0 : i32
    return %arg1, %arg0 : i32, i32
  }
}

</mosaic_0001>

<bundles_post_ra>
// kernel: tpu_custom_call.1
= control target key start
LH: loop header
LB: loop body
LE: loop exit
PB: predicated region body
PF: predicated region fallthrough
CT: control target
= control target key end

     0   :  { %12 = vsyncpa [#allocation3], 0  ;;  %s468_s0 = inlined_call_operand.hbm [shape: bf16[8,32], index: 0, kind: input, shape index: {}]   ;;  %s469_s1 = inlined_call_operand.hbm [shape: bf16[32,32], index: 1, kind: input, shape index: {}]   ;;  %s470_s2 = inlined_call_operand.vmem [shape: f32[1,32], index: 2, kind: input, shape index: {}]   ;;  %s471_s3 = inlined_call_operand.hbm [shape: bf16[32,32], index: 3, kind: input, shape index: {}]   ;;  %s472_s4 = inlined_call_operand.vmem [shape: f32[1,32], index: 4, kind: input, shape index: {}]   ;;  %s473_s5 = inlined_call_operand.hbm [shape: bf16[32,128], index: 5, kind: input, shape index: {}]   ;;  %s474_s6 = inlined_call_operand.vmem [shape: f32[1,128], index: 6, kind: input, shape index: {}]   ;;  %s475_s7 = inlined_call_operand.hbm [shape: f32[8,128], index: 7, kind: output, shape index: {}]  }
   0x1   :  { %13 = vsyncpa [#allocation6], 0 }
   0x2   :  { %14 = vsyncpa [#allocation9], 0  ;;  %s31_s26 = sshll.u32 %s469_s1, 4  ;;  %s32_s26 = int_to_ptr.hbm [resolvable:$true] %s31_s26 }
   0x3   :  { %15 = vsyncpa [#allocation4], 0  ;;  %s394_s27 = smov [#allocation5]   ;;  %s21_s8 = sshll.u32 %s468_s0, 4  ;;  %s22_s8 = int_to_ptr.hbm [resolvable:$true] %s21_s8 }
   0x4   :  { %s33_s28 = sshll.u32 %s394_s27, 4  ;;  %s395_s9 = smov 64   ;;  %s34_s28 = int_to_ptr.vmem [resolvable:$true] %s33_s28 }
   0x5   :  { %s396_s10 = smov 4   ;;  %s397_s11 = smov [#allocation2]  }
   0x6   :  { %39 = dma.hbm_to_vmem [thread:$0]  %s32_s26, 256, %s34_s28, [#allocation6], %s395_s9, %s395_s9, %s396_s10  }
   0x7   :  { %s23_s12 = sshll.u32 %s397_s11, 4  ;;  %s46_s15 = sshll.u32 %s471_s3, 4  ;;  %s24_s12 = int_to_ptr.vmem [resolvable:$true] %s23_s12  ;;  %s47_s15 = int_to_ptr.hbm [resolvable:$true] %s46_s15 }
   0x8   :  { %26 = dma.hbm_to_vmem [thread:$0]  %s22_s8, 64, %s24_s12, [#allocation3]  }
   0x9   :  { %s61_s17 = sshll.u32 %s473_s5, 4  ;;  %s398_s18 = smov [#allocation7]   ;;  %s62_s17 = int_to_ptr.hbm [resolvable:$true] %s61_s17 }
   0xa   :  { %s48_s19 = sshll.u32 %s398_s18, 4  ;;  %s399_s0 = smov [#allocation8]   ;;  %s49_s19 = int_to_ptr.vmem [resolvable:$true] %s48_s19 }
   0xb   :  { %54 = dma.hbm_to_vmem [thread:$0]  %s47_s15, 256, %s49_s19, [#allocation6], %s395_s9, %s395_s9, %s396_s10  }
   0xc   :  { %s63_s20 = sshll.u32 %s399_s0, 4  ;;  %s64_s20 = int_to_ptr.vmem [resolvable:$true] %s63_s20 }
   0xd   :  { %69 = dma.hbm_to_vmem [thread:$0]  %s62_s17, 256, %s64_s20, [#allocation9], %s395_s9, %s395_s9, %s396_s10  }
   0xe   :  { %386 = dma.done.wait [#allocation3], 64  }
   0xf   :  { %387 = vsyncadd [#allocation3], 4294967232 }
  0x10   :  { %388 = dma.done.wait [#allocation6], 512  }
  0x11   :  { %389 = vsyncadd [#allocation6], 4294966784 }
  0x12   :  { %390 = dma.done.wait [#allocation9], 256  }
  0x13   :  { %391 = vsyncadd [#allocation9], 4294967040  ;;  %v251_v0 = vld [vmem:[#allocation5 + $0x8] sm:$0xff]  ;;  %v250_v1 = vld [vmem:[#allocation5] sm:$0xff]  ;;  %vm110_vm0 = vcmask 261120   ;;  %s400_s24 = smov [#allocation10]  }
  0x14   :  { %120 = vmatpush.bf16.msra.mxu0 %v251_v0  ;;  %v89_v2 = vld [vmem:[#allocation2] sm:$0xf]  ;;  %v252_v4 = vld [vmem:[#allocation7] sm:$0xff]  ;;  %v255_v11 = vld [vmem:[#allocation8 + $0x8] sm:$0xff]  ;;  %s209_s25 = sshll.u32 %s400_s24, 4  ;;  %s211_s28 = sshll.u32 %s475_s7, 4  ;;  %s210_s25 = int_to_ptr.vmem [resolvable:$true] %s209_s25  ;;  %s212_s28 = int_to_ptr.hbm [resolvable:$true] %s211_s28 }
  0x15   :  { %v253_v3 = vld [vmem:[#allocation7 + $0x8] sm:$0xff]  ;;  %196 = vmatpush.bf16.msra.mxu2 %v255_v11  ;;  %v254_v12 = vld [vmem:[#allocation8] sm:$0xff] }
  0x16   :  { %158 = vmatpush.bf16.msra.mxu1 %v253_v3  ;;  %v263_v5 = vld [vmem:[%s470_s2] ss:$0 sm:$0xff] }
  0x17   :  { %v264_v13 = vld [vmem:[%s472_s4] ss:$0 sm:$0xff] }
  0x18   :  { %121 = vmatpush.bf16.msra.mxu0 %v250_v1  ;;  %v265_v19 = vld [vmem:[%s474_s6] ss:$0 sm:$0xff] }
  0x19   :  { %197 = vmatpush.bf16.msra.mxu2 %v254_v12 }
  0x1a   :  { %159 = vmatpush.bf16.msra.mxu1 %v252_v4 }
  0x1b   :  { %231 = vmatmul.msk.bf16.vlgmr.msra.gmra.mxu0 %vm110_vm0, %v89_v2 }
  0x98   :  { %v123_v6 = vpop.f32.mrf.mxu0 }
  0x99   :  { %v124_v7 = vadd.f32 %v263_v5, %v123_v6 }
  0x9b   :  { %v127_v8 = vmax.f32 %v124_v7, 0.0 }
  0x9d   :  { %v128_v9 = vpack.c.bf16 %v127_v8, %v127_v8 }
  0x9f   :  { %240 = vmatmul.msk.bf16.vlgmr.msra.gmra.mxu1 %vm110_vm0, %v128_v9 }
  0xa0   :  { %v125_v10 = vpop.f32.mrf.mxu0 }
 0x11c   :  { %v161_v14 = vpop.f32.mrf.mxu1 }
 0x11d   :  { %v162_v15 = vadd.f32 %v264_v13, %v161_v14 }
 0x11f   :  { %v165_v16 = vmax.f32 %v162_v15, 0.0 }
 0x121   :  { %v166_v17 = vpack.c.bf16 %v165_v16, %v165_v16 }
 0x123   :  { %249 = vmatmul.msk.bf16.vlgmr.msra.gmra.mxu2 %vm110_vm0, %v166_v17 }
 0x124   :  { %v163_v18 = vpop.f32.mrf.mxu1 }
 0x1a6   :  { %v199_v20 = vpop.f32.mrf.mxu2 }
 0x1a7   :  { %v200_v21 = vadd.f32 %v265_v19, %v199_v20 }
 0x1a9   :  { %203 = vst [vmem:[#allocation10] sm:$0xff] %v200_v21 }
 0x1aa   :  { %214 = dma.vmem_to_hbm [thread:$0]  %s210_s25, 128, %s212_s28, [#allocation4]  }
 0x1ae   :  { %v201_v22 = vpop.f32.mrf.mxu2 }
 0x1af   :  { %392 = dma.done.wait [#allocation4], 128  }
 0x1b0   :  { %393 = vsyncadd [#allocation4], 4294967168 }
 0x1b1   :  { %219 = vsyncpa [#allocation3], 1 }
 0x1b2   :  { %220 = vsyncpa [#allocation6], 1 }
 0x1b3   :  { %221 = vsyncpa [#allocation9], 1 }
 0x1b4   :  { %222 = vsyncpa [#allocation4], 1 }

</bundles_post_ra>
